<compile_context>
chip_gen: v6e
topology: v6e:2x2x1
jax: 0.10.0
libtpu: 0.0.40
codegen_flags: <defaults>
</compile_context>

<pallas_src>
import jax
import jax.numpy as jnp
from jax.experimental import pallas as pl
from jax.experimental.pallas import tpu as pltpu


def _attention_kernel(x_ref, w1_ref, b1_ref, w2_ref, out_ref):
    # x_ref:  (TB, T, D)   TB batch rows, full sequence, full feature dim
    # w1_ref: (D, H)   b1_ref: (1, H)
    # w2_ref: (1, H)   (H->1 projection fed as a row vector)
    # out_ref: (TB, D)
    TB, T, D = x_ref.shape

    x = x_ref[...]                      # keep native dtype for the MXU operand
    # Collapse (TB, T) into the MXU M dimension. D (lane dim) is unchanged and the
    # test/typical T is a multiple of 8, so this reshape is layout-free.
    x2 = x.reshape(TB * T, D)

    # Linear(2H -> H) + Tanh : one MXU matmul, f32 accumulation, tanh on the EUP.
    h = jnp.tanh(
        jnp.dot(x2, w1_ref[...], preferred_element_type=jnp.float32) + b1_ref[...]
    )  # (TB*T, H) f32

    # Linear(H -> 1) as a VPU multiply + XLU lane reduce. b2 is omitted: adding a
    # constant to the scores does not change the softmax.
    s = jnp.sum(h * w2_ref[...], axis=-1, keepdims=True)     # (TB*T, 1)
    s = s.reshape(TB, T, 1)

    # Softmax over the sequence axis (dim=1 in the torch module), max-subtracted
    # for numerical stability. These are cheap sublane reductions (T elements/row).
    m = jnp.max(s, axis=1, keepdims=True)                     # (TB, 1, 1)
    e = jnp.exp(s - m)                                        # (TB, T, 1)
    denom = jnp.sum(e, axis=1, keepdims=True)                 # (TB, 1, 1)

    # Unnormalized weighted sum over the sequence (f32 accumulation), then one EUP
    # approximate reciprocal to apply the softmax normalization.
    acc = jnp.sum(x.astype(jnp.float32) * e, axis=1)          # (TB, D)
    inv = pl.reciprocal(denom.reshape(TB, 1), approx=True)    # (TB, 1)
    out_ref[...] = (acc * inv).astype(out_ref.dtype)


def _pick_batch_block(B, T, D, itemsize, vmem_budget_bytes=8 << 20):
    """Pick the batch tile so one x block stays within a modest VMEM budget
    (double-buffered by the pipeline) while amortizing the ~0.35us/step grid
    overhead with the largest block that fits. Keeps TB a multiple of 8 when
    possible so the (TB, D) output store is sublane-dense."""
    per_row = max(T * D * itemsize, 1)
    tb = max(1, vmem_budget_bytes // per_row)
    tb = min(tb, B)
    if tb >= 8:
        tb = (tb // 8) * 8
    return max(tb, 1)


def attention_module(hidden_states, w1, b1, w2, b2=None, *, batch_block=None):
    """Pallas implementation of AttentionModule.forward.

    hidden_states: (B, T, D) with D = 2 * hidden_size
    w1: (D, H), b1: (H,), w2: (H, 1), b2: (1,) (unused: softmax shift-invariance)
    returns: (B, D)
    """
    del b2  # softmax(s + c) == softmax(s): the final Linear bias never matters.
    B, T, D = hidden_states.shape
    H = w1.shape[1]

    if batch_block is None:
        TB = _pick_batch_block(B, T, D, hidden_states.dtype.itemsize)
    else:
        TB = max(1, min(batch_block, B))

    b1_2d = b1.reshape(1, H)
    w2_row = w2.reshape(1, H)  # H->1 projection as a row vector for the lane reduce

    # TODO(synk): for sequences too long to hold one (TB, T, D) block in VMEM
    # (v7x has 64 MiB), add a T-tiled "arbitrary" grid axis with an online-softmax
    # accumulator instead of a single block per step.
    return pl.pallas_call(
        _attention_kernel,
        out_shape=jax.ShapeDtypeStruct((B, D), hidden_states.dtype),
        grid_spec=pltpu.PrefetchScalarGridSpec(
            num_scalar_prefetch=0,
            grid=(pl.cdiv(B, TB),),
            in_specs=[
                pl.BlockSpec((TB, T, D), lambda i: (i, 0, 0)),  # x (batch-blocked)
                pl.BlockSpec((D, H), lambda i: (0, 0)),         # w1 (shared, resident)
                pl.BlockSpec((1, H), lambda i: (0, 0)),         # b1
                pl.BlockSpec((1, H), lambda i: (0, 0)),         # w2 as a row
            ],
            out_specs=pl.BlockSpec((TB, D), lambda i: (i, 0)),
        ),
        compiler_params=pltpu.CompilerParams(
            dimension_semantics=("parallel",),
        ),
    )(hidden_states, w1, b1_2d, w2_row)


def _reference(hidden_states, w1, b1, w2, b2):
    # pure-JAX reference of the torch forward (keeps b2 for fidelity)
    s = jnp.tanh(hidden_states @ w1 + b1) @ w2 + b2            # (B, T, 1)
    w = jax.nn.softmax(s, axis=1)                              # softmax over seq dim
    return jnp.sum(hidden_states * w, axis=1)                  # (B, D)


if __name__ == "__main__":
    hidden_size = 32
    B, T = 2, 8
    D = hidden_size * 2

    key = jax.random.PRNGKey(0)
    kx, k1, kb1, k2, kb2 = jax.random.split(key, 5)

    hidden_states = jax.random.normal(kx, (B, T, D), dtype=jnp.float32)
    # deterministic synthetic parameters (Linear(2H->H), Linear(H->1))
    w1 = jax.random.normal(k1, (D, hidden_size), dtype=jnp.float32) * 0.1
    b1 = jax.random.normal(kb1, (hidden_size,), dtype=jnp.float32) * 0.1
    w2 = jax.random.normal(k2, (hidden_size, 1), dtype=jnp.float32) * 0.1
    b2 = jax.random.normal(kb2, (1,), dtype=jnp.float32) * 0.1

    out = attention_module(hidden_states, w1, b1, w2, b2)
    out = jax.block_until_ready(out)

    ref = _reference(hidden_states, w1, b1, w2, b2)
    assert out.shape == (B, D)
    # approx=True reciprocal (EUP) trades a few ulps on the softmax denom for a
    # free-slot op; keep the correctness check at 1e-3.
    assert jnp.allclose(out, ref, atol=1e-3, rtol=1e-3), "mismatch vs reference"

    print("KERNEL_OK")
</pallas_src>

<mosaic_0001>
module attributes {stable_mosaic.version = 11 : i64} {
  func.func @_attention_kernel(%arg0: i32, %arg1: memref<2x8x64xf32, #tpu.memory_space<vmem>>, %arg2: memref<64x32xf32, #tpu.memory_space<vmem>>, %arg3: memref<1x32xf32, #tpu.memory_space<vmem>>, %arg4: memref<1x32xf32, #tpu.memory_space<vmem>>, %arg5: memref<2x64xf32, #tpu.memory_space<vmem>>) attributes {dimension_semantics = [#tpu.dimension_semantics<parallel>], iteration_bounds = array<i64: 1>, scalar_prefetch = 0 : i64, scratch_operands = 0 : i64, tpu.core_type = #tpu.core_type<tc>, window_params = [{transform_indices = @transform_0, window_bounds = array<i64: 2, 8, 64>}, {pipeline_mode = #tpu.pipeline_mode<synchronous>, transform_indices = @transform_1, window_bounds = array<i64: 64, 32>}, {pipeline_mode = #tpu.pipeline_mode<synchronous>, transform_indices = @transform_2, window_bounds = array<i64: 1, 32>}, {pipeline_mode = #tpu.pipeline_mode<synchronous>, transform_indices = @transform_3, window_bounds = array<i64: 1, 32>}, {transform_indices = @transform_4, window_bounds = array<i64: 2, 64>}]} {
    %c0 = arith.constant 0 : index
    %c0_0 = arith.constant 0 : index
    %c0_1 = arith.constant 0 : index
    %0 = vector.load %arg1[%c0, %c0_0, %c0_1] : memref<2x8x64xf32, #tpu.memory_space<vmem>>, vector<2x8x64xf32>
    %1 = vector.shape_cast %0 : vector<2x8x64xf32> to vector<16x64xf32>
    %c0_2 = arith.constant 0 : index
    %c0_3 = arith.constant 0 : index
    %2 = vector.load %arg2[%c0_2, %c0_3] : memref<64x32xf32, #tpu.memory_space<vmem>>, vector<64x32xf32>
    %cst = arith.constant dense<0.000000e+00> : vector<16x32xf32>
    %3 = tpu.matmul %1, %2, %cst {dimension_numbers = #tpu.dot_dimension_numbers<[1], [0], [0], [1], [0, 0, 1, 1], [], []>} : vector<16x64xf32>, vector<64x32xf32>, vector<16x32xf32> -> vector<16x32xf32>
    %c0_4 = arith.constant 0 : index
    %c0_5 = arith.constant 0 : index
    %4 = vector.load %arg3[%c0_4, %c0_5] : memref<1x32xf32, #tpu.memory_space<vmem>>, vector<1x32xf32>
    %5 = vector.broadcast %4 : vector<1x32xf32> to vector<16x32xf32>
    %6 = arith.addf %3, %5 : vector<16x32xf32>
    %7 = math.tanh %6 : vector<16x32xf32>
    %c0_6 = arith.constant 0 : index
    %c0_7 = arith.constant 0 : index
    %8 = vector.load %arg4[%c0_6, %c0_7] : memref<1x32xf32, #tpu.memory_space<vmem>>, vector<1x32xf32>
    %9 = vector.broadcast %8 : vector<1x32xf32> to vector<16x32xf32>
    %10 = arith.mulf %7, %9 : vector<16x32xf32>
    %cst_8 = arith.constant dense<0.000000e+00> : vector<16xf32>
    %11 = vector.multi_reduction <add>, %10, %cst_8 [1] : vector<16x32xf32> to vector<16xf32>
    %12 = vector.shape_cast %11 : vector<16xf32> to vector<16x1xf32>
    %13 = vector.shape_cast %12 : vector<16x1xf32> to vector<2x8x1xf32>
    %cst_9 = arith.constant dense<0xFF800000> : vector<2x1xf32>
    %14 = vector.multi_reduction <maximumf>, %13, %cst_9 [1] : vector<2x8x1xf32> to vector<2x1xf32>
    %15 = vector.shape_cast %14 : vector<2x1xf32> to vector<2x1x1xf32>
    %16 = vector.broadcast %15 : vector<2x1x1xf32> to vector<2x8x1xf32>
    %17 = arith.subf %13, %16 : vector<2x8x1xf32>
    %18 = math.exp %17 : vector<2x8x1xf32>
    %cst_10 = arith.constant dense<0.000000e+00> : vector<2x1xf32>
    %19 = vector.multi_reduction <add>, %18, %cst_10 [1] : vector<2x8x1xf32> to vector<2x1xf32>
    %20 = vector.shape_cast %19 : vector<2x1xf32> to vector<2x1x1xf32>
    %21 = vector.broadcast %18 : vector<2x8x1xf32> to vector<2x8x64xf32>
    %22 = arith.mulf %0, %21 : vector<2x8x64xf32>
    %cst_11 = arith.constant dense<0.000000e+00> : vector<2x64xf32>
    %23 = vector.multi_reduction <add>, %22, %cst_11 [1] : vector<2x8x64xf32> to vector<2x64xf32>
    %24 = vector.shape_cast %20 : vector<2x1x1xf32> to vector<2x1xf32>
    %25 = tpu.reciprocal %24 {approx = true} : vector<2x1xf32> -> vector<2x1xf32>
    %26 = vector.broadcast %25 : vector<2x1xf32> to vector<2x64xf32>
    %27 = arith.mulf %23, %26 : vector<2x64xf32>
    %c0_12 = arith.constant 0 : index
    %c0_13 = arith.constant 0 : index
    %28 = vector.load %arg5[%c0_12, %c0_13] : memref<2x64xf32, #tpu.memory_space<vmem>>, vector<2x64xf32>
    tpu.vector_store %arg5[%c0_12, %c0_13], %27 {strides = array<i32>} : memref<2x64xf32, #tpu.memory_space<vmem>>, vector<2x64xf32>,
    return
  }
  func.func @transform_0(%arg0: i32) -> (i32, i32, i32) {
    %c0_i32 = arith.constant 0 : i32
    %c0_i32_0 = arith.constant 0 : i32
    %c0_i32_1 = arith.constant 0 : i32
    return %arg0, %c0_i32, %c0_i32_0 : i32, i32, i32
  }
  func.func @transform_1(%arg0: i32) -> (i32, i32) {
    %c0_i32 = arith.constant 0 : i32
    %c0_i32_0 = arith.constant 0 : i32
    %c0_i32_1 = arith.constant 0 : i32
    return %c0_i32, %c0_i32_0 : i32, i32
  }
  func.func @transform_2(%arg0: i32) -> (i32, i32) {
    %c0_i32 = arith.constant 0 : i32
    %c0_i32_0 = arith.constant 0 : i32
    %c0_i32_1 = arith.constant 0 : i32
    return %c0_i32, %c0_i32_0 : i32, i32
  }
  func.func @transform_3(%arg0: i32) -> (i32, i32) {
    %c0_i32 = arith.constant 0 : i32
    %c0_i32_0 = arith.constant 0 : i32
    %c0_i32_1 = arith.constant 0 : i32
    return %c0_i32, %c0_i32_0 : i32, i32
  }
  func.func @transform_4(%arg0: i32) -> (i32, i32) {
    %c0_i32 = arith.constant 0 : i32
    %c0_i32_0 = arith.constant 0 : i32
    return %arg0, %c0_i32 : i32, i32
  }
}

</mosaic_0001>

<bundles_post_ra>
// kernel: tpu_custom_call.1
= control target key start
LH: loop header
LB: loop body
LE: loop exit
PB: predicated region body
PF: predicated region fallthrough
CT: control target
= control target key end

     0   :  { %vm35_vm0 = vcmask 523264   ;;  %s347_s0 = inlined_call_operand.vmem [shape: f32[2,8,64], index: 0, kind: input, shape index: {}]   ;;  %s348_s1 = inlined_call_operand.vmem [shape: f32[64,32], index: 1, kind: input, shape index: {}]   ;;  %s349_s2 = inlined_call_operand.vmem [shape: f32[1,32], index: 2, kind: input, shape index: {}]   ;;  %s350_s3 = inlined_call_operand.vmem [shape: f32[1,32], index: 3, kind: input, shape index: {}]   ;;  %s351_s4 = inlined_call_operand.hbm [shape: f32[2,64], index: 4, kind: output, shape index: {}]  }
   0x1   :  { %v27_v0 = vld [vmem:[%s348_s1 + $0x38] sm:$0xff]  ;;  %v26_v1 = vld [vmem:[%s348_s1 + $0x30] sm:$0xff]  ;;  %v25_v2 = vld [vmem:[%s348_s1 + $0x28] sm:$0xff] }
   0x2   :  { %220 = vmatprep.subr.mxu0 %v27_v0  ;;  %v312_v3 = vld [vmem:[%s347_s0] sm:$0xff] }
   0x3   :  { %221 = vmatpush3.msra.mxu0 %v27_v0  ;;  %236 = vmatprep.mubr.msk.f32.mxu0 %vm35_vm0, %v312_v3 }
   0x4   :  { %222 = vmatprep.subr.mxu0 %v26_v1 }
   0x5   :  { %9 = vsyncpa [#allocation3], 0  ;;  %223 = vmatpush3.msra.mxu0 %v26_v1  ;;  %v24_v4 = vld [vmem:[%s348_s1 + $0x20] sm:$0xff]  ;;  %v23_v5 = vld [vmem:[%s348_s1 + $0x18] sm:$0xff]  ;;  %vm128_vm1 = vcmask 261120   ;;  %vm187_vm2 = vcmask 1041409  }
   0x6   :  { %224 = vmatprep.subr.mxu0 %v25_v2  ;;  %v22_v6 = vld [vmem:[%s348_s1 + $0x10] sm:$0xff]  ;;  %v21_v7 = vld [vmem:[%s348_s1 + $0x8] sm:$0xff]  ;;  %v20_v8 = vld [vmem:[%s348_s1] sm:$0xff]  ;;  %vm190_vm3 = vcmask 517120  }
   0x7   :  { %225 = vmatpush3.msra.mxu0 %v25_v2  ;;  %v19_v9 = vld [vmem:[%s347_s0 + $0x8] sm:$0xff]  ;;  %v206_v10 = vld [vmem:[%s349_s2] ss:$0 sm:$0xff]  ;;  %s274_s0 = smov [#allocation2]  }
   0x8   :  { %226 = vmatprep.subr.mxu0 %v24_v4  ;;  %v209_v17 = vld [vmem:[%s350_s3] ss:$0 sm:$0xff]  ;;  %s198_s2 = sshll.u32 %s274_s0, 4  ;;  %s199_s2 = int_to_ptr.vmem [resolvable:$true] %s198_s2 }
   0x9   :  { %227 = vmatpush3.msra.mxu0 %v24_v4  ;;  %s252_s3 = scalar_lea.vmem %s199_s2, 32  ;;  %p257_p1 = scmp.lt.s32.totalorder %s199_s2, %s199_s2 }
   0xa   :  { %228 = vmatprep.subr.mxu0 %v23_v5  ;;  %p253_p0 = scmp.ne.s32.totalorder %s199_s2, %s252_s3  ;;  %p258_p2 = scmp.lt.s32.totalorder %s252_s3, %s252_s3 }
   0xb   :  { %229 = vmatpush3.msra.mxu0 %v23_v5 }
   0xc   :  { %230 = vmatprep.subr.mxu0 %v22_v6  ;;  %p259_p3 = por %p258_p2, %p257_p1 }
   0xd   :  { %231 = vmatpush3.msra.mxu0 %v22_v6 }
   0xe   :  { %232 = vmatprep.subr.mxu0 %v21_v7  ;;  %p260_p4 = pnand %p259_p3, %p253_p0 }
   0xf   :  { %233 = vmatpush3.msra.mxu0 %v21_v7 }
  0x10   :  { %234 = vmatprep.subr.mxu0 %v20_v8 }
  0x11   :  { %235 = vmatpush3.msra.mxu0 %v20_v8 }
  0x12   :  { %237 = vmatmul.mubr.msk.f32.vlgmr.msra.gmra.mxu0 %vm35_vm0, %v19_v9 }
  0xd2   :  { %v238_v11 = vpop.f32.mrf.mxu0 }
  0xd3   :  { %v114_v12 = vadd.f32 %v238_v11, %v206_v10 }
  0xd4   :  { %v108_v13 = vpop.f32.mrf.mxu0 }
  0xd5   :  { %v109_v14 = vadd.f32 %v206_v10, %v108_v13  ;;  %240 = vtanh.f32 %v114_v12 }
  0xd7   :  { %242 = vtanh.f32 %v109_v14 }
  0xe2   :  { %v241_v15 = vpop.eup %240 }
  0xe3   :  { %v127_v20 = vmul.f32 %v241_v15, %v209_v17 }
  0xe4   :  { %v243_v16 = vpop.eup %242 }
  0xe5   :  { %v126_v18 = vmul.f32 %v243_v16, %v209_v17  ;;  %v132_v21 = vsel %vm128_vm1, %v127_v20, 0.0 }
  0xe7   :  { %v129_v19 = vsel %vm128_vm1, %v126_v18, 0.0 }
  0xe8   :  { %130 = vadd.xlane.f32.xlu0 %v129_v19 }
  0xec   :  { %133 = vadd.xlane.f32.xlu0 %v132_v21 }
 0x171   :  { %v131_v22 = vpop.xlane.xlu0 %130 }
 0x172   :  { %v135_v23 = vrot.slane %v131_v22, 4 }
 0x174   :  { %v136_v24 = vmax.f32 %v131_v22, %v135_v23 }
 0x175   :  { %v134_v25 = vpop.xlane.xlu0 %133 }
 0x176   :  { %v137_v26 = vrot.slane %v136_v24, 2  ;;  %v141_v27 = vrot.slane %v134_v25, 4 }
 0x178   :  { %v138_v28 = vmax.f32 %v136_v24, %v137_v26  ;;  %v142_v29 = vmax.f32 %v134_v25, %v141_v27 }
 0x17a   :  { %v139_v30 = vrot.slane %v138_v28, 1  ;;  %v143_v31 = vrot.slane %v142_v29, 2 }
 0x17c   :  { %v140_v32 = vmax.f32 %v138_v28, %v139_v30  ;;  %v144_v33 = vmax.f32 %v142_v29, %v143_v31 }
 0x17e   :  { %v147_v34 = vsub.f32 %v131_v22, %v140_v32  ;;  %v145_v35 = vrot.slane %v144_v33, 1 }
 0x180   :  { %v149_v36 = vmul.f32 1.442695, %v147_v34  ;;  %v146_v37 = vmax.f32 %v144_v33, %v145_v35 }
 0x182   :  { %244 = vpow2.f32 %v149_v36  ;;  %v148_v38 = vsub.f32 %v134_v25, %v146_v37 }
 0x184   :  { %v151_v39 = vmul.f32 1.442695, %v148_v38 }
 0x186   :  { %246 = vpow2.f32 %v151_v39 }
 0x18f   :  { %v245_v40 = vpop.eup %244 }
 0x190   :  { %v153_v41 = vrot.slane %v245_v40, 4  ;;  %v165_v42 = vmul.f32 %v245_v40, %v312_v3 }
 0x192   :  { %v154_v43 = vadd.f32 %v245_v40, %v153_v41  ;;  %v167_v48 = vsel %vm35_vm0, %v165_v42, 0.0 }
 0x193   :  { %v247_v44 = vpop.eup %246  ;;  %v168_v54 = vrot.slane %v167_v48, 4 }
 0x194   :  { %v155_v45 = vrot.slane %v154_v43, 2  ;;  %v159_v46 = vrot.slane %v247_v44, 4  ;;  %v166_v47 = vmul.f32 %v247_v44, %v19_v9 }
 0x195   :  { %v169_v59 = vadd.f32 %v168_v54, %v167_v48 }
 0x196   :  { %v156_v49 = vadd.f32 %v155_v45, %v154_v43  ;;  %v160_v50 = vadd.f32 %v247_v44, %v159_v46  ;;  %v174_v51 = vsel %vm35_vm0, %v166_v47, 0.0 }
 0x197   :  { %v175_v55 = vrot.slane %v174_v51, 4  ;;  %v170_v62 = vrot.slane %v169_v59, 2 }
 0x198   :  { %v157_v52 = vrot.slane %v156_v49, 1  ;;  %v161_v53 = vrot.slane %v160_v50, 2 }
 0x199   :  { %v176_v60 = vadd.f32 %v175_v55, %v174_v51  ;;  %v171_v0 = vadd.f32 %v170_v62, %v169_v59 }
 0x19a   :  { %v158_v56 = vadd.f32 %v157_v52, %v156_v49  ;;  %v162_v57 = vadd.f32 %v161_v53, %v160_v50 }
 0x19b   :  { %v177_v63 = vrot.slane %v176_v60, 2  ;;  %v172_v2 = vrot.slane %v171_v0, 1 }
 0x19c   :  { %v163_v58 = vrot.slane %v162_v57, 1  ;;  %248 = vrcp.f32 %v158_v56 }
 0x19d   :  { %v178_v1 = vadd.f32 %v177_v63, %v176_v60  ;;  %v173_v5 = vadd.f32 %v172_v2, %v171_v0 }
 0x19e   :  { %v164_v61 = vadd.f32 %v163_v58, %v162_v57 }
 0x19f   :  { %v179_v3 = vrot.slane %v178_v1, 1 }
 0x1a0   :  { %250 = vrcp.f32 %v164_v61 }
 0x1a1   :  { %v180_v6 = vadd.f32 %v179_v3, %v178_v1 }
 0x1a9   :  { %v249_v4 = vpop.eup %248 }
 0x1aa   :  { %v183_v8 = vmul.f32 %v249_v4, %v173_v5 }
 0x1ad   :  { %v251_v7 = vpop.eup %250 }
 0x1ae   :  { %v184_v9 = vmul.f32 %v251_v7, %v180_v6 }
 0x1b0   :  { %v188_v10 = vsel %vm187_vm2, %v184_v9, %v183_v8 }
 0x1b1   :  { %191 = vst.msk [vmem:[#allocation2] sm:$0x3] %vm190_vm3, %v188_v10 }
 0x1b2   :  { %263 = shalt.err (!%p260_p4)
}
 0x1b3   :  { %201 = dma.vmem_to_hbm [thread:$0]  %s199_s2, 32, %s351_s4, [#allocation3]  }
 0x1b4   :  { %272 = dma.done.wait [#allocation3], 32  }
 0x1b5   :  { %273 = vsyncadd [#allocation3], 4294967264 }
 0x1b6   :  { %205 = vsyncpa [#allocation3], 1 }

</bundles_post_ra>
